<compile_context>
chip_gen: v5e
topology: v5e:2x2
jax: 0.10.0
libtpu: 0.0.40
codegen_flags: <defaults>
</compile_context>

<pallas_src>
import jax
import jax.numpy as jnp
from jax import lax
from jax.experimental import pallas as pl
from jax.experimental.pallas import tpu as pltpu


def _round_up(x, m):
    return (x + m - 1) // m * m


def _make_kernel(k, stride, Wo):
    """out(E, TP) = sum over k*k taps of  W_tap(E, C) @ X_tap(C, TP)  + shift."""

    def kernel(xt_ref, xh_ref, w_ref, shift_ref, o_ref):
        # xt_ref:    (TAPS, C, TP)   tap-source windows for this tile (TAPS = stride*k)
        # xh_ref:    (TAPS, C, HALO) head of the *next* tile's window (halo)
        # w_ref:     (k*k, E, C)     conv weight per tap, BN scale pre-folded
        # shift_ref: (E, 1)          folded BN shift (+ conv bias), f32
        # o_ref:     (E, TP)
        E, TP = o_ref.shape
        acc = jnp.zeros((E, TP), jnp.float32)
        for kh in range(k):
            hph, dh = kh % stride, kh // stride
            for kw in range(k):
                t = hph * k + kw
                rhs = xt_ref[t]                                  # (C, TP)
                if dh > 0:
                    off = dh * Wo
                    # window shifted by dh output rows: tail = next tile's head
                    rhs = jnp.concatenate(
                        [rhs[:, off:], xh_ref[t][:, :off]], axis=1)
                acc = acc + jnp.dot(w_ref[kh * k + kw], rhs,
                                    preferred_element_type=jnp.float32)
        o_ref[...] = (acc + shift_ref[...]).astype(o_ref.dtype)

    return kernel


def embedding_forward(x, conv_w, conv_b, bn_gamma, bn_beta, bn_mean, bn_var,
                      *, patch_size=3, stride=2, padding=1, eps=1e-5,
                      compute_dtype=jnp.bfloat16, out_dtype=None):
    """x: [B, C, H, W] (NCHW, like PyTorch). Returns [B, E, Ho, Wo]."""
    B, C, H, W = x.shape
    E = conv_w.shape[0]
    k, s, p = patch_size, stride, padding
    Ho = (H + 2 * p - k) // s + 1
    Wo = (W + 2 * p - k) // s + 1
    P = Ho * Wo
    TAPS = s * k                       # (H-phase, kw) source arrays
    K2 = k * k
    dh_max = (k - 1) // s              # max row shift inside a phase array
    HALO = max(dh_max, 1) * Wo

    if compute_dtype is None:
        compute_dtype = x.dtype
    if out_dtype is None:
        out_dtype = x.dtype
    ib = jnp.dtype(compute_dtype).itemsize
    ob = jnp.dtype(out_dtype).itemsize

    # ---- pick TP (output pixels per grid step), dtype & chip aware ----
    try:
        vmem_cap = getattr(pltpu.get_tpu_info(), "vmem_capacity_bytes", 64 * 2**20)
    except Exception:  # not on TPU / older API -> conservative v7x-safe default
        vmem_cap = 64 * 2**20
    vmem_limit = max(32 * 2**20, min(int(vmem_cap) * 3 // 4, 100 * 2**20))
    budget = vmem_limit - (2 << 20)

    def vmem_est(tp):
        xt_b = 2 * TAPS * C * tp * ib        # double-buffered input tile
        xh_b = 2 * TAPS * C * HALO * ib      # double-buffered halo tile
        w_b = K2 * E * C * ib                # resident (constant index_map)
        out_b = 2 * E * tp * ob              # double-buffered output tile
        acc_b = 3 * E * tp * 4               # f32 accumulator + matmul temps
        return xt_b + xh_b + w_b + out_b + acc_b + 4 * E

    TP_min = max(128, _round_up(dh_max * Wo, 128))
    TP = max(TP_min, min(2048, _round_up(P, 128)))
    while TP - 128 >= TP_min and vmem_est(TP) > budget:
        TP -= 128
    n_p = pl.cdiv(P, TP)
    TP = max(TP_min, _round_up(pl.cdiv(P, n_p), 128))   # trim padding waste
    P_pad = n_p * TP

    # ---- host-side layout prep (one cheap pass; no NCHW<->NHWC transposes) ----
    # Zero-pad spatially so every strided tap slice below is in bounds.
    HP2 = s * (Ho + dh_max)
    WP2 = s * (Wo - 1) + k
    x_p = jnp.pad(x, ((0, 0), (0, 0),
                      (p, max(0, HP2 - p - H)),
                      (p, max(0, WP2 - p - W))))[:, :, :HP2, :WP2]

    # Tap-source arrays: xt[:, hph*k+kw, c, i*Wo + wo] = x_p[:, c, s*i + hph, s*wo + kw]
    # so conv tap (kh, kw) reads flat offset p + (kh//s)*Wo for output pixel p.
    rows = Ho + dh_max
    taps = []
    for hph in range(s):
        for kw in range(k):
            sl = x_p[:, :, hph: hph + s * (rows - 1) + 1: s,
                           kw: kw + s * (Wo - 1) + 1: s]          # [B, C, rows, Wo]
            taps.append(sl.reshape(B, C, rows * Wo))
    xt_full = jnp.stack(taps, axis=1)                              # [B, TAPS, C, Lv]
    Lv = rows * Wo
    L_need = P_pad + HALO
    xt_full = jnp.pad(xt_full, ((0, 0), (0, 0), (0, 0), (0, max(0, L_need - Lv))))
    xt = xt_full[..., :P_pad].astype(compute_dtype)                # [B, TAPS, C, P_pad]

    # Halo: first HALO source elements of each tile's *next* window (tiny array).
    idx = jnp.arange(n_p)[:, None] * TP + TP + jnp.arange(HALO)[None, :]
    xh = jnp.moveaxis(xt_full[..., idx], 3, 1).astype(compute_dtype)  # [B,n_p,TAPS,C,HALO]

    # Fold BN (running stats): scale into the weights (in f32), shift as epilogue.
    scale = (bn_gamma / jnp.sqrt(bn_var + eps)).astype(jnp.float32)        # (E,)
    shift = (bn_beta + (conv_b - bn_mean) * scale).astype(jnp.float32).reshape(E, 1)
    w9 = jnp.transpose(conv_w, (2, 3, 0, 1)).reshape(K2, E, C).astype(jnp.float32)
    w9 = (w9 * scale[None, :, None]).astype(compute_dtype)                 # (K2, E, C)

    # ---- Pallas kernel: per (image, P-tile): k*k accumulated matmuls + shift ----
    kernel = _make_kernel(k, s, Wo)
    out = pl.pallas_call(
        kernel,
        out_shape=jax.ShapeDtypeStruct((B, E, P_pad), out_dtype),
        grid=(B, n_p),
        in_specs=[
            pl.BlockSpec((None, TAPS, C, TP), lambda b, j: (b, 0, 0, j)),
            pl.BlockSpec((None, None, TAPS, C, HALO), lambda b, j: (b, j, 0, 0, 0)),
            pl.BlockSpec((K2, E, C), lambda b, j: (0, 0, 0)),
            pl.BlockSpec((E, 1), lambda b, j: (0, 0)),
        ],
        out_specs=pl.BlockSpec((None, E, TP), lambda b, j: (b, 0, j)),
        compiler_params=pltpu.CompilerParams(
            dimension_semantics=("parallel", "parallel"),
            vmem_limit_bytes=vmem_limit,
        ),
    )(xt, xh, w9, shift)

    # [B, E, P_pad] -> [B, E, Ho, Wo] : already NCHW, the reshape is free.
    return out[:, :, :P].reshape(B, E, Ho, Wo)


def _reference(x, conv_w, conv_b, bn_gamma, bn_beta, bn_mean, bn_var,
               *, stride=2, padding=1, eps=1e-5):
    y = lax.conv_general_dilated(
        x, conv_w, window_strides=(stride, stride),
        padding=[(padding, padding), (padding, padding)],
        dimension_numbers=("NCHW", "OIHW", "NCHW"))
    y = y + conv_b[None, :, None, None]
    inv = 1.0 / jnp.sqrt(bn_var + eps)
    return ((y - bn_mean[None, :, None, None]) * inv[None, :, None, None]
            * bn_gamma[None, :, None, None] + bn_beta[None, :, None, None])


if __name__ == "__main__":
    # Small, module-consistent shapes.
    B, C, H, W = 2, 4, 16, 16
    E, k, stride, padding = 32, 3, 2, 1

    key = jax.random.PRNGKey(0)
    ks = jax.random.split(key, 7)
    x = jax.random.normal(ks[0], (B, C, H, W), jnp.float32)
    conv_w = jax.random.normal(ks[1], (E, C, k, k), jnp.float32) * 0.1
    conv_b = jax.random.normal(ks[2], (E,), jnp.float32) * 0.1
    # BatchNorm2d parameters / running stats (inference-mode semantics).
    bn_gamma = 1.0 + 0.1 * jax.random.normal(ks[3], (E,), jnp.float32)
    bn_beta = 0.1 * jax.random.normal(ks[4], (E,), jnp.float32)
    bn_mean = 0.1 * jax.random.normal(ks[5], (E,), jnp.float32)
    bn_var = jnp.abs(jax.random.normal(ks[6], (E,), jnp.float32)) + 0.5

    y_ref = _reference(x, conv_w, conv_b, bn_gamma, bn_beta, bn_mean, bn_var,
                       stride=stride, padding=padding)

    # f32 compute path: tight numerical check.
    y32 = embedding_forward(x, conv_w, conv_b, bn_gamma, bn_beta, bn_mean, bn_var,
                            patch_size=k, stride=stride, padding=padding,
                            compute_dtype=jnp.float32)
    y32 = jax.block_until_ready(y32)
    assert y32.shape == (B, E, H // stride, W // stride)
    assert jnp.allclose(y32, y_ref, atol=1e-4, rtol=1e-4)

    # Default bf16 compute path (f32 accumulation): loose check.
    ybf = embedding_forward(x, conv_w, conv_b, bn_gamma, bn_beta, bn_mean, bn_var,
                            patch_size=k, stride=stride, padding=padding)
    ybf = jax.block_until_ready(ybf)
    assert ybf.shape == (B, E, H // stride, W // stride)
    assert jnp.allclose(ybf, y_ref, atol=6e-2, rtol=6e-2)

    print("KERNEL_OK")
</pallas_src>

<mosaic_0001>
module attributes {stable_mosaic.version = 11 : i64} {
  func.func @kernel(%arg0: i32, %arg1: i32, %arg2: memref<1x6x4x128xf32, #tpu.memory_space<vmem>>, %arg3: memref<1x1x6x4x8xf32, #tpu.memory_space<vmem>>, %arg4: memref<9x32x4xf32, #tpu.memory_space<vmem>>, %arg5: memref<32x1xf32, #tpu.memory_space<vmem>>, %arg6: memref<1x32x128xf32, #tpu.memory_space<vmem>>) attributes {dimension_semantics = [#tpu.dimension_semantics<parallel>, #tpu.dimension_semantics<parallel>], iteration_bounds = array<i64: 2, 1>, scalar_prefetch = 0 : i64, scratch_operands = 0 : i64, tpu.core_type = #tpu.core_type<tc>, window_params = [{transform_indices = @transform_0, window_bounds = array<i64: 1, 6, 4, 128>}, {transform_indices = @transform_1, window_bounds = array<i64: 1, 1, 6, 4, 8>}, {pipeline_mode = #tpu.pipeline_mode<synchronous>, transform_indices = @transform_2, window_bounds = array<i64: 9, 32, 4>}, {pipeline_mode = #tpu.pipeline_mode<synchronous>, transform_indices = @transform_3, window_bounds = array<i64: 32, 1>}, {transform_indices = @transform_4, window_bounds = array<i64: 1, 32, 128>}]} {
    %cst = arith.constant 0.000000e+00 : f32
    %0 = vector.broadcast %cst : f32 to vector<32x128xf32>
    %c0 = arith.constant 0 : index
    %c0_0 = arith.constant 0 : index
    %c0_1 = arith.constant 0 : index
    %c0_2 = arith.constant 0 : index
    %1 = vector.load %arg2[%c0, %c0_0, %c0_1, %c0_2] : memref<1x6x4x128xf32, #tpu.memory_space<vmem>>, vector<1x1x4x128xf32>
    %2 = vector.shape_cast %1 : vector<1x1x4x128xf32> to vector<4x128xf32>
    %c0_3 = arith.constant 0 : index
    %c0_4 = arith.constant 0 : index
    %c0_5 = arith.constant 0 : index
    %3 = vector.load %arg4[%c0_3, %c0_4, %c0_5] : memref<9x32x4xf32, #tpu.memory_space<vmem>>, vector<1x32x4xf32>
    %4 = vector.shape_cast %3 : vector<1x32x4xf32> to vector<32x4xf32>
    %cst_6 = arith.constant dense<0.000000e+00> : vector<32x128xf32>
    %5 = tpu.matmul %4, %2, %cst_6 {dimension_numbers = #tpu.dot_dimension_numbers<[1], [0], [0], [1], [0, 0, 1, 1], [], []>} : vector<32x4xf32>, vector<4x128xf32>, vector<32x128xf32> -> vector<32x128xf32>
    %6 = arith.addf %0, %5 : vector<32x128xf32>
    %c0_7 = arith.constant 0 : index
    %c1 = arith.constant 1 : index
    %c0_8 = arith.constant 0 : index
    %c0_9 = arith.constant 0 : index
    %7 = vector.load %arg2[%c0_7, %c1, %c0_8, %c0_9] : memref<1x6x4x128xf32, #tpu.memory_space<vmem>>, vector<1x1x4x128xf32>
    %8 = vector.shape_cast %7 : vector<1x1x4x128xf32> to vector<4x128xf32>
    %c1_10 = arith.constant 1 : index
    %c0_11 = arith.constant 0 : index
    %c0_12 = arith.constant 0 : index
    %9 = vector.load %arg4[%c1_10, %c0_11, %c0_12] : memref<9x32x4xf32, #tpu.memory_space<vmem>>, vector<1x32x4xf32>
    %10 = vector.shape_cast %9 : vector<1x32x4xf32> to vector<32x4xf32>
    %cst_13 = arith.constant dense<0.000000e+00> : vector<32x128xf32>
    %11 = tpu.matmul %10, %8, %cst_13 {dimension_numbers = #tpu.dot_dimension_numbers<[1], [0], [0], [1], [0, 0, 1, 1], [], []>} : vector<32x4xf32>, vector<4x128xf32>, vector<32x128xf32> -> vector<32x128xf32>
    %12 = arith.addf %6, %11 : vector<32x128xf32>
    %c0_14 = arith.constant 0 : index
    %c2 = arith.constant 2 : index
    %c0_15 = arith.constant 0 : index
    %c0_16 = arith.constant 0 : index
    %13 = vector.load %arg2[%c0_14, %c2, %c0_15, %c0_16] : memref<1x6x4x128xf32, #tpu.memory_space<vmem>>, vector<1x1x4x128xf32>
    %14 = vector.shape_cast %13 : vector<1x1x4x128xf32> to vector<4x128xf32>
    %c2_17 = arith.constant 2 : index
    %c0_18 = arith.constant 0 : index
    %c0_19 = arith.constant 0 : index
    %15 = vector.load %arg4[%c2_17, %c0_18, %c0_19] : memref<9x32x4xf32, #tpu.memory_space<vmem>>, vector<1x32x4xf32>
    %16 = vector.shape_cast %15 : vector<1x32x4xf32> to vector<32x4xf32>
    %cst_20 = arith.constant dense<0.000000e+00> : vector<32x128xf32>
    %17 = tpu.matmul %16, %14, %cst_20 {dimension_numbers = #tpu.dot_dimension_numbers<[1], [0], [0], [1], [0, 0, 1, 1], [], []>} : vector<32x4xf32>, vector<4x128xf32>, vector<32x128xf32> -> vector<32x128xf32>
    %18 = arith.addf %12, %17 : vector<32x128xf32>
    %c0_21 = arith.constant 0 : index
    %c3 = arith.constant 3 : index
    %c0_22 = arith.constant 0 : index
    %c0_23 = arith.constant 0 : index
    %19 = vector.load %arg2[%c0_21, %c3, %c0_22, %c0_23] : memref<1x6x4x128xf32, #tpu.memory_space<vmem>>, vector<1x1x4x128xf32>
    %20 = vector.shape_cast %19 : vector<1x1x4x128xf32> to vector<4x128xf32>
    %c3_24 = arith.constant 3 : index
    %c0_25 = arith.constant 0 : index
    %c0_26 = arith.constant 0 : index
    %21 = vector.load %arg4[%c3_24, %c0_25, %c0_26] : memref<9x32x4xf32, #tpu.memory_space<vmem>>, vector<1x32x4xf32>
    %22 = vector.shape_cast %21 : vector<1x32x4xf32> to vector<32x4xf32>
    %cst_27 = arith.constant dense<0.000000e+00> : vector<32x128xf32>
    %23 = tpu.matmul %22, %20, %cst_27 {dimension_numbers = #tpu.dot_dimension_numbers<[1], [0], [0], [1], [0, 0, 1, 1], [], []>} : vector<32x4xf32>, vector<4x128xf32>, vector<32x128xf32> -> vector<32x128xf32>
    %24 = arith.addf %18, %23 : vector<32x128xf32>
    %c0_28 = arith.constant 0 : index
    %c4 = arith.constant 4 : index
    %c0_29 = arith.constant 0 : index
    %c0_30 = arith.constant 0 : index
    %25 = vector.load %arg2[%c0_28, %c4, %c0_29, %c0_30] : memref<1x6x4x128xf32, #tpu.memory_space<vmem>>, vector<1x1x4x128xf32>
    %26 = vector.shape_cast %25 : vector<1x1x4x128xf32> to vector<4x128xf32>
    %c4_31 = arith.constant 4 : index
    %c0_32 = arith.constant 0 : index
    %c0_33 = arith.constant 0 : index
    %27 = vector.load %arg4[%c4_31, %c0_32, %c0_33] : memref<9x32x4xf32, #tpu.memory_space<vmem>>, vector<1x32x4xf32>
    %28 = vector.shape_cast %27 : vector<1x32x4xf32> to vector<32x4xf32>
    %cst_34 = arith.constant dense<0.000000e+00> : vector<32x128xf32>
    %29 = tpu.matmul %28, %26, %cst_34 {dimension_numbers = #tpu.dot_dimension_numbers<[1], [0], [0], [1], [0, 0, 1, 1], [], []>} : vector<32x4xf32>, vector<4x128xf32>, vector<32x128xf32> -> vector<32x128xf32>
    %30 = arith.addf %24, %29 : vector<32x128xf32>
    %c0_35 = arith.constant 0 : index
    %c5 = arith.constant 5 : index
    %c0_36 = arith.constant 0 : index
    %c0_37 = arith.constant 0 : index
    %31 = vector.load %arg2[%c0_35, %c5, %c0_36, %c0_37] : memref<1x6x4x128xf32, #tpu.memory_space<vmem>>, vector<1x1x4x128xf32>
    %32 = vector.shape_cast %31 : vector<1x1x4x128xf32> to vector<4x128xf32>
    %c5_38 = arith.constant 5 : index
    %c0_39 = arith.constant 0 : index
    %c0_40 = arith.constant 0 : index
    %33 = vector.load %arg4[%c5_38, %c0_39, %c0_40] : memref<9x32x4xf32, #tpu.memory_space<vmem>>, vector<1x32x4xf32>
    %34 = vector.shape_cast %33 : vector<1x32x4xf32> to vector<32x4xf32>
    %cst_41 = arith.constant dense<0.000000e+00> : vector<32x128xf32>
    %35 = tpu.matmul %34, %32, %cst_41 {dimension_numbers = #tpu.dot_dimension_numbers<[1], [0], [0], [1], [0, 0, 1, 1], [], []>} : vector<32x4xf32>, vector<4x128xf32>, vector<32x128xf32> -> vector<32x128xf32>
    %36 = arith.addf %30, %35 : vector<32x128xf32>
    %c0_42 = arith.constant 0 : index
    %c0_43 = arith.constant 0 : index
    %c0_44 = arith.constant 0 : index
    %c0_45 = arith.constant 0 : index
    %37 = vector.load %arg2[%c0_42, %c0_43, %c0_44, %c0_45] : memref<1x6x4x128xf32, #tpu.memory_space<vmem>>, vector<1x1x4x128xf32>
    %38 = vector.shape_cast %37 : vector<1x1x4x128xf32> to vector<4x128xf32>
    %39 = vector.extract_strided_slice %38 {offsets = [0, 8], sizes = [4, 120], strides = [1, 1]} : vector<4x128xf32> to vector<4x120xf32>
    %c0_46 = arith.constant 0 : index
    %c0_47 = arith.constant 0 : index
    %c0_48 = arith.constant 0 : index
    %c0_49 = arith.constant 0 : index
    %c0_50 = arith.constant 0 : index
    %40 = vector.load %arg3[%c0_46, %c0_47, %c0_48, %c0_49, %c0_50] : memref<1x1x6x4x8xf32, #tpu.memory_space<vmem>>, vector<1x1x1x4x8xf32>
    %41 = vector.shape_cast %40 : vector<1x1x1x4x8xf32> to vector<4x8xf32>
    %42 = tpu.concatenate %39, %41 in 1 : vector<4x120xf32>, vector<4x8xf32> -> vector<4x128xf32>
    %c6 = arith.constant 6 : index
    %c0_51 = arith.constant 0 : index
    %c0_52 = arith.constant 0 : index
    %43 = vector.load %arg4[%c6, %c0_51, %c0_52] : memref<9x32x4xf32, #tpu.memory_space<vmem>>, vector<1x32x4xf32>
    %44 = vector.shape_cast %43 : vector<1x32x4xf32> to vector<32x4xf32>
    %cst_53 = arith.constant dense<0.000000e+00> : vector<32x128xf32>
    %45 = tpu.matmul %44, %42, %cst_53 {dimension_numbers = #tpu.dot_dimension_numbers<[1], [0], [0], [1], [0, 0, 1, 1], [], []>} : vector<32x4xf32>, vector<4x128xf32>, vector<32x128xf32> -> vector<32x128xf32>
    %46 = arith.addf %36, %45 : vector<32x128xf32>
    %c0_54 = arith.constant 0 : index
    %c1_55 = arith.constant 1 : index
    %c0_56 = arith.constant 0 : index
    %c0_57 = arith.constant 0 : index
    %47 = vector.load %arg2[%c0_54, %c1_55, %c0_56, %c0_57] : memref<1x6x4x128xf32, #tpu.memory_space<vmem>>, vector<1x1x4x128xf32>
    %48 = vector.shape_cast %47 : vector<1x1x4x128xf32> to vector<4x128xf32>
    %49 = vector.extract_strided_slice %48 {offsets = [0, 8], sizes = [4, 120], strides = [1, 1]} : vector<4x128xf32> to vector<4x120xf32>
    %c0_58 = arith.constant 0 : index
    %c0_59 = arith.constant 0 : index
    %c1_60 = arith.constant 1 : index
    %c0_61 = arith.constant 0 : index
    %c0_62 = arith.constant 0 : index
    %50 = vector.load %arg3[%c0_58, %c0_59, %c1_60, %c0_61, %c0_62] : memref<1x1x6x4x8xf32, #tpu.memory_space<vmem>>, vector<1x1x1x4x8xf32>
    %51 = vector.shape_cast %50 : vector<1x1x1x4x8xf32> to vector<4x8xf32>
    %52 = tpu.concatenate %49, %51 in 1 : vector<4x120xf32>, vector<4x8xf32> -> vector<4x128xf32>
    %c7 = arith.constant 7 : index
    %c0_63 = arith.constant 0 : index
    %c0_64 = arith.constant 0 : index
    %53 = vector.load %arg4[%c7, %c0_63, %c0_64] : memref<9x32x4xf32, #tpu.memory_space<vmem>>, vector<1x32x4xf32>
    %54 = vector.shape_cast %53 : vector<1x32x4xf32> to vector<32x4xf32>
    %cst_65 = arith.constant dense<0.000000e+00> : vector<32x128xf32>
    %55 = tpu.matmul %54, %52, %cst_65 {dimension_numbers = #tpu.dot_dimension_numbers<[1], [0], [0], [1], [0, 0, 1, 1], [], []>} : vector<32x4xf32>, vector<4x128xf32>, vector<32x128xf32> -> vector<32x128xf32>
    %56 = arith.addf %46, %55 : vector<32x128xf32>
    %c0_66 = arith.constant 0 : index
    %c2_67 = arith.constant 2 : index
    %c0_68 = arith.constant 0 : index
    %c0_69 = arith.constant 0 : index
    %57 = vector.load %arg2[%c0_66, %c2_67, %c0_68, %c0_69] : memref<1x6x4x128xf32, #tpu.memory_space<vmem>>, vector<1x1x4x128xf32>
    %58 = vector.shape_cast %57 : vector<1x1x4x128xf32> to vector<4x128xf32>
    %59 = vector.extract_strided_slice %58 {offsets = [0, 8], sizes = [4, 120], strides = [1, 1]} : vector<4x128xf32> to vector<4x120xf32>
    %c0_70 = arith.constant 0 : index
    %c0_71 = arith.constant 0 : index
    %c2_72 = arith.constant 2 : index
    %c0_73 = arith.constant 0 : index
    %c0_74 = arith.constant 0 : index
    %60 = vector.load %arg3[%c0_70, %c0_71, %c2_72, %c0_73, %c0_74] : memref<1x1x6x4x8xf32, #tpu.memory_space<vmem>>, vector<1x1x1x4x8xf32>
    %61 = vector.shape_cast %60 : vector<1x1x1x4x8xf32> to vector<4x8xf32>
    %62 = tpu.concatenate %59, %61 in 1 : vector<4x120xf32>, vector<4x8xf32> -> vector<4x128xf32>
    %c8 = arith.constant 8 : index
    %c0_75 = arith.constant 0 : index
    %c0_76 = arith.constant 0 : index
    %63 = vector.load %arg4[%c8, %c0_75, %c0_76] : memref<9x32x4xf32, #tpu.memory_space<vmem>>, vector<1x32x4xf32>
    %64 = vector.shape_cast %63 : vector<1x32x4xf32> to vector<32x4xf32>
    %cst_77 = arith.constant dense<0.000000e+00> : vector<32x128xf32>
    %65 = tpu.matmul %64, %62, %cst_77 {dimension_numbers = #tpu.dot_dimension_numbers<[1], [0], [0], [1], [0, 0, 1, 1], [], []>} : vector<32x4xf32>, vector<4x128xf32>, vector<32x128xf32> -> vector<32x128xf32>
    %66 = arith.addf %56, %65 : vector<32x128xf32>
    %c0_78 = arith.constant 0 : index
    %c0_79 = arith.constant 0 : index
    %67 = vector.load %arg5[%c0_78, %c0_79] : memref<32x1xf32, #tpu.memory_space<vmem>>, vector<32x1xf32>
    %68 = vector.broadcast %67 : vector<32x1xf32> to vector<32x128xf32>
    %69 = arith.addf %66, %68 : vector<32x128xf32>
    %c0_80 = arith.constant 0 : index
    %c0_81 = arith.constant 0 : index
    %c0_82 = arith.constant 0 : index
    %70 = vector.load %arg6[%c0_80, %c0_81, %c0_82] : memref<1x32x128xf32, #tpu.memory_space<vmem>>, vector<1x32x128xf32>
    %71 = vector.shape_cast %70 : vector<1x32x128xf32> to vector<32x128xf32>
    %72 = vector.shape_cast %69 : vector<32x128xf32> to vector<1x32x128xf32>
    tpu.vector_store %arg6[%c0_80, %c0_81, %c0_82], %72 {strides = array<i32>} : memref<1x32x128xf32, #tpu.memory_space<vmem>>, vector<1x32x128xf32>,
    return
  }
  func.func @transform_0(%arg0: i32, %arg1: i32) -> (i32, i32, i32, i32) {
    %c0_i32 = arith.constant 0 : i32
    %c0_i32_0 = arith.constant 0 : i32
    %c0_i32_1 = arith.constant 0 : i32
    return %arg0, %c0_i32, %c0_i32_0, %arg1 : i32, i32, i32, i32
  }
  func.func @transform_1(%arg0: i32, %arg1: i32) -> (i32, i32, i32, i32, i32) {
    %c0_i32 = arith.constant 0 : i32
    %c0_i32_0 = arith.constant 0 : i32
    %c0_i32_1 = arith.constant 0 : i32
    %c0_i32_2 = arith.constant 0 : i32
    return %arg0, %arg1, %c0_i32, %c0_i32_0, %c0_i32_1 : i32, i32, i32, i32, i32
  }
  func.func @transform_2(%arg0: i32, %arg1: i32) -> (i32, i32, i32) {
    %c0_i32 = arith.constant 0 : i32
    %c0_i32_0 = arith.constant 0 : i32
    %c0_i32_1 = arith.constant 0 : i32
    %c0_i32_2 = arith.constant 0 : i32
    return %c0_i32, %c0_i32_0, %c0_i32_1 : i32, i32, i32
  }
  func.func @transform_3(%arg0: i32, %arg1: i32) -> (i32, i32) {
    %c0_i32 = arith.constant 0 : i32
    %c0_i32_0 = arith.constant 0 : i32
    %c0_i32_1 = arith.constant 0 : i32
    return %c0_i32, %c0_i32_0 : i32, i32
  }
  func.func @transform_4(%arg0: i32, %arg1: i32) -> (i32, i32, i32) {
    %c0_i32 = arith.constant 0 : i32
    %c0_i32_0 = arith.constant 0 : i32
    return %arg0, %c0_i32, %arg1 : i32, i32, i32
  }
}

</mosaic_0001>

<bundles_post_ra>
// kernel: tpu_custom_call.1
= control target key start
LH: loop header
LB: loop body
LE: loop exit
PB: predicated region body
PF: predicated region fallthrough
CT: control target
= control target key end

     0   :  { %9 = vsyncpa [#allocation3], 0  ;;  %s1475_s0 = inlined_call_operand.vmem [shape: f32[2,6,4,128], index: 0, kind: input, shape index: {}]   ;;  %s1476_s1 = inlined_call_operand.vmem [shape: f32[2,1,6,4,8], index: 1, kind: input, shape index: {}]   ;;  %s1477_s2 = inlined_call_operand.vmem [shape: f32[9,32,4], index: 2, kind: input, shape index: {}]   ;;  %s1478_s3 = inlined_call_operand.vmem [shape: f32[32,1], index: 3, kind: input, shape index: {}]   ;;  %s1479_s4 = inlined_call_operand.hbm [shape: f32[2,32,128], index: 4, kind: output, shape index: {}]  }
   0x1   :  { %11 = vsyncpa [#allocation3 + $0x1], 0  ;;  %s1187_s15 = smov 0   ;;  %s1189_s16 = smov 0  }
   0x2   :  { %s1191_s17 = smov 0   ;;  %s1193_s18 = smov 0  }
   0x3   :  { %s1195_s19 = smov 0   ;;  %s1197_s20 = smov 0  }
   0x4 LB: > { %s914_s21 = sadd.s32 4294967295, %s1156_s20   ;;  %s915_s22 = sadd.s32 4294967294, %s1156_s20   ;;  %s1156_s20 = sphi %s1197_s20, %s17_s20   ;;  %s1152_s19 = sphi %s1195_s19, %s1486_s19   ;;  %s1148_s18 = sphi %s1193_s18, %s1485_s18   ;;  %s1144_s17 = sphi %s1191_s17, %s1484_s17   ;;  %s1140_s16 = sphi %s1189_s16, %s1483_s16   ;;  %s1136_s15 = sphi %s1187_s15, %s1482_s15  }
   0x5   : > { %s29_s23 = sadd.s32 1, %s1152_s19  ;;  %s136_s24 = sadd.s32 1, %s1144_s17 }
   0x6   : > { %p31_p0 = scmp.ge.s32.totalorder %s29_s23, 2  ;;  %p146_p1 = scmp.ne.s32.totalorder %s1144_s17, %s1140_s16 }
   0x7   : > { %p147_p2 = scmp.eq.s32.totalorder %s914_s21, 1  ;;  %p152_p3 = scmp.ne.s32.totalorder %s1140_s16, %s1136_s15 }
   0x8   : > { %s1488_s23 = smov (%p31_p0, %s29_s23), 0  ;;  %p153_p5 = scmp.eq.s32.totalorder %s915_s22, 1 }
   0x9   : > { %p1227_p4 = por %p147_p2, %p146_p1  ;;  %s131_s26 = ssub.s32 %s1152_s19, %s1488_s23 }
   0xa   : > { %p918_p6 = scmp.ge.s32.totalorder %s1156_s20, 1  ;;  %p134_p7 = scmp.eq.s32.totalorder %s131_s26, 0 }
   0xb   : > { %p1234_p8 = por %p153_p5, %p152_p3  ;;  %p200_p9 = scmp.lt.s32.totalorder %s1156_s20, 3 }
   0xc   : > { %s1240_s28 = scalar_select %p134_p7, %s1144_s17, %s136_s24  }
   0xd   : > { %p201_p10 = pnand %p918_p6, %p200_p9 }
   0xe   : > { %p238_p11 = scmp.lt.s32.totalorder (!%p201_p10), %s1148_s18, 1  ;;  %s1158_s10 = smov (!%p201_p10), 120  }
   0xf   : > { %204 = sbr.rel (%p201_p10) target bundleno = 319 (0x13f), region = 36  ;;  %s235_s13 = sand.u32 (!%p201_p10), 1, %s1140_s16  }
  0x10   : > { %s919_s14 = sshll.u32 (!%p201_p10), %s235_s13, 5  ;;  %s1098_s9 = scalar_lea.hbm (!%p201_p10), %s1479_s4, 64 }
  0x14   : > { %s239_s29 = scalar_select %p238_p11, %s1148_s18, 1  ;;  %vm280_vm0 = vcmask 1043456   ;;  %v924_v2 = vld [vmem:[%s1477_s2 + $0x28] sm:$0xff]  ;;  %vm267_vm1 = vcmask 31744   ;;  %v925_v4 = vld [vmem:[%s1477_s2 + $0x30] sm:$0xff]  ;;  %v926_v5 = vld [vmem:[%s1477_s2 + $0x38] sm:$0xff] }
  0x15   : > { %v923_v7 = vld [vmem:[%s1477_s2 + $0x20] sm:$0xff]  ;;  %v257_v17 = vld [vmem:[%s1477_s2 + $0x8] sm:$0xff]  ;;  %v258_v21 = vld [vmem:[%s1477_s2 + $0x10] sm:$0xff]  ;;  %vm585_vm2 = vcmask 982016   ;;  %v1159_v40 = vmov 0  }
  0x16   : > { %s1015_s30 = smul.u32 24, %s239_s29  ;;  %v256_v13 = vld [vmem:[%s1477_s2] sm:$0xff]  ;;  %v939_v18 = vld [vmem:[%s1477_s2 + $0x48] sm:$0xff]  ;;  %v940_v22 = vld [vmem:[%s1477_s2 + $0x50] sm:$0xff]  ;;  %1075 = vset.pattern.permute.xlu0 %v1159_v40  ;;  %1076 = vset.pattern.permute.xlu1 %v1159_v40 }
  0x17   : > { %v938_v14 = vld [vmem:[%s1477_s2 + $0x40] sm:$0xff]  ;;  %v949_v19 = vld [vmem:[%s1477_s2 + $0x68] sm:$0xff]  ;;  %v950_v23 = vld [vmem:[%s1477_s2 + $0x70] sm:$0xff]  ;;  %1077 = vset.pattern.permute.xlu2 %v1159_v40 }
  0x18   : > { %s245_s7 = scalar_lea.vmem %s1475_s0, %s1015_s30  ;;  %s254_s21 = scalar_lea.vmem %s1476_s1, %s1015_s30  ;;  %v948_v15 = vld [vmem:[%s1477_s2 + $0x60] sm:$0xff]  ;;  %v959_v20 = vld [vmem:[%s1477_s2 + $0x88] sm:$0xff]  ;;  %v259_v24 = vld [vmem:[%s1477_s2 + $0x18] sm:$0xff] }
  0x19   : > { %v922_v0 = vld [vmem:[%s245_s7 + $0x4] sm:$0xf]  ;;  %v255_v1 = vld [vmem:[%s245_s7] sm:$0xf]  ;;  %v937_v3 = vld [vmem:[%s245_s7 + $0x8] sm:$0xf] }
  0x1a   : > { %642 = vrot.lane.b32.xlu1 %v922_v0, %s1158_s10  ;;  %578 = vrot.lane.b32.xlu0 %v255_v1, %s1158_s10  ;;  %v947_v6 = vld [vmem:[%s245_s7 + $0xc] sm:$0xf]  ;;  %v957_v8 = vld [vmem:[%s245_s7 + $0x10] sm:$0xf] }
  0x1b   : > { %705 = vrot.lane.b32.xlu2 %v937_v3, %s1158_s10  ;;  %1012 = vmatpush.msk.msra.mxu1 %vm280_vm0, %v922_v0  ;;  %v967_v9 = vld [vmem:[%s245_s7 + $0x14] sm:$0xf]  ;;  %v986_v10 = vld [vmem:[%s254_s21 + $0x4] sm:$0xf]  ;;  %v577_v11 = vld [vmem:[%s254_s21] sm:$0xf] }
  0x1c   : > { %929 = vmatmul.msk.f32.vlgmr.msra.gmra.mxu1 %vm267_vm1, %v924_v2  ;;  %1013 = vmatpush.msk.msra.mxu2 %vm280_vm0, %v922_v0  ;;  %v996_v12 = vld [vmem:[%s254_s21 + $0x8] sm:$0xf]  ;;  %v958_v16 = vld [vmem:[%s1477_s2 + $0x80] sm:$0xff]  ;;  %v941_v27 = vld [vmem:[%s1477_s2 + $0x58] sm:$0xff]  ;;  %s1011_s21 = sshll.u32 %s1148_s18, 5  ;;  %s799_s18 = scalar_lea.sflag [#allocation3], %s235_s13 }
  0x1d   : > { %932 = vmatpush.msk.msrb.mxu1 %vm280_vm0, %v255_v1  ;;  %930 = vmatmul.msk.f32.vlgmr.msra.gmra.mxu2 %vm267_vm1, %v925_v4  ;;  %v968_v25 = vld [vmem:[%s1477_s2 + $0xa0] sm:$0xff]  ;;  %v969_v26 = vld [vmem:[%s1477_s2 + $0xa8] sm:$0xff]  ;;  %v951_v28 = vld [vmem:[%s1477_s2 + $0x78] sm:$0xff]  ;;  %s811_s26 = scalar_lea.hbm %s1479_s4, %s1011_s21 }
  0x1e   : > { %1014 = vmatpush.msk.msra.mxu3 %vm280_vm0, %v922_v0  ;;  %942 = vmatpush.msk.msrb.mxu2 %vm280_vm0, %v937_v3  ;;  %v960_v29 = vld [vmem:[%s1477_s2 + $0x90] sm:$0xff]  ;;  %v961_v31 = vld [vmem:[%s1477_s2 + $0x98] sm:$0xff]  ;;  %v997_v36 = vld [vmem:[%s1477_s2 + $0x100] sm:$0xff]  ;;  %s814_s30 = sshll.u32 %s811_s26, 4  ;;  %s815_s30 = int_to_ptr.hbm [resolvable:$true] %s814_s30 }
  0x1f   : > { %931 = vmatmul.msk.f32.vlgmr.msra.gmra.mxu3 %vm267_vm1, %v926_v5  ;;  %927 = vmatpush.msk.msra.mxu0 %vm280_vm0, %v922_v0  ;;  %v970_v30 = vld [vmem:[%s1477_s2 + $0xb0] sm:$0xff]  ;;  %v971_v32 = vld [vmem:[%s1477_s2 + $0xb8] sm:$0xff]  ;;  %v998_v37 = vld [vmem:[%s1477_s2 + $0x108] sm:$0xff]  ;;  %s1092_s5 = sshra.s32 %s815_s30, 4  ;;  %s1093_s5 = int_to_ptr.hbm [resolvable:$true] %s1092_s5 }
  0x20   : > { %952 = vmatpush.msk.msrb.mxu3 %vm280_vm0, %v947_v6  ;;  %928 = vmatmul.msk.f32.vlgmr.msra.gmra.mxu0 %vm267_vm1, %v923_v7  ;;  %v766_v41 = vld [vmem:[%s1478_s3] sm:$0xff]  ;;  %v999_v42 = vld [vmem:[%s1477_s2 + $0x110] sm:$0xff]  ;;  %v767_v43 = vld [vmem:[%s1478_s3 + $0x8] sm:$0xff]  ;;  %s1094_s6 = scalar_lea.hbm %s1093_s5, 32  ;;  %p1099_p1 = scmp.lt.s32.totalorder %s1093_s5, %s1479_s4 }
  0x21   : > { %962 = vmatpush.msk.msrb.mxu0 %vm280_vm0, %v957_v8  ;;  %972 = vmatpush.msk.msra.mxu1 %vm280_vm0, %v967_v9  ;;  %v768_v44 = vld [vmem:[%s1478_s3 + $0x10] sm:$0xff]  ;;  %v977_v47 = vld [vmem:[%s1477_s2 + $0xc0] sm:$0xff]  ;;  %v1000_v51 = vld [vmem:[%s1477_s2 + $0x118] sm:$0xff]  ;;  %p1095_p12 = scmp.ne.s32.totalorder %s1093_s5, %s1094_s6  ;;  %p1100_p2 = scmp.lt.s32.totalorder %s1098_s9, %s1094_s6 }
  0x22   : > { %646 = vrot.lane.b32.xlu1 %v986_v10, %s1158_s10  ;;  %582 = vrot.lane.b32.xlu0 %v577_v11, %s1158_s10  ;;  %v987_v48 = vld [vmem:[%s1477_s2 + $0xe0] sm:$0xff]  ;;  %v769_v52 = vld [vmem:[%s1478_s3 + $0x18] sm:$0xff] }
  0x23   : > { %709 = vrot.lane.b32.xlu2 %v996_v12, %s1158_s10  ;;  %v978_v53 = vld [vmem:[%s1477_s2 + $0xc8] sm:$0xff]  ;;  %v979_v55 = vld [vmem:[%s1477_s2 + $0xd0] sm:$0xff]  ;;  %v980_v57 = vld [vmem:[%s1477_s2 + $0xd8] sm:$0xff]  ;;  %s1430_s10 = scalar_lea.vmem [#allocation2], %s919_s14  ;;  %p1096_p13 = pnand %p1095_p12, %p1227_p4 }
  0x24   : > { %933 = vmatmul.msk.f32.vlgmr.msrb.gmra.mxu1 %vm267_vm1, %v256_v13  ;;  %v988_v54 = vld [vmem:[%s1477_s2 + $0xe8] sm:$0xff]  ;;  %v989_v56 = vld [vmem:[%s1477_s2 + $0xf0] sm:$0xff]  ;;  %v990_v58 = vld [vmem:[%s1477_s2 + $0xf8] sm:$0xff]  ;;  %s812_s29 = sshll.u32 %s1430_s10, 4  ;;  %p1101_p3 = por %p1100_p2, %p1099_p1  ;;  %s813_s29 = int_to_ptr.vmem [resolvable:$true] %s812_s29 }
  0x25   : > { %943 = vmatmul.msk.f32.vlgmr.msrb.gmra.mxu2 %vm267_vm1, %v938_v14  ;;  %p1097_p0 = pneg %p1096_p13 }
  0x27   : > { %953 = vmatmul.msk.f32.vlgmr.msrb.gmra.mxu3 %vm267_vm1, %v948_v15  ;;  %p1102_p5 = pnand %p1101_p3, %p1097_p0 }
  0x28   : > { %963 = vmatmul.msk.f32.vlgmr.msrb.gmra.mxu0 %vm267_vm1, %v958_v16 }
  0x2a   : > { %772 = vperm.xlu0 %1075, %v766_v41   ;;  %777 = vperm.xlu1 %1076, %v767_v43  }
  0x2b   : > { %782 = vperm.xlu2 %1077, %v768_v44  }
  0x2c   : > { %934 = vmatmul.msk.f32.gmra.mxu1 %vm267_vm1, %v257_v17 }
  0x2d   : > { %944 = vmatmul.msk.f32.gmra.mxu2 %vm267_vm1, %v939_v18 }
  0x2f   : > { %954 = vmatmul.msk.f32.gmra.mxu3 %vm267_vm1, %v949_v19 }
  0x30   : > { %964 = vmatmul.msk.f32.gmra.mxu0 %vm267_vm1, %v959_v20 }
  0x32   : > { %787 = vperm.xlu1 %1076, %v769_v52  }
  0x34   : > { %935 = vmatmul.msk.f32.gmra.mxu1 %vm267_vm1, %v258_v21 }
  0x35   : > { %945 = vmatmul.msk.f32.gmra.mxu2 %vm267_vm1, %v940_v22 }
  0x37   : > { %955 = vmatmul.msk.f32.gmra.mxu3 %vm267_vm1, %v950_v23 }
  0x38   : > { %965 = vmatmul.msk.f32.gmra.mxu0 %vm267_vm1, %v960_v29 }
  0x3c   : > { %936 = vmatmul.msk.f32.gmra.mxu1 %vm267_vm1, %v259_v24 }
  0x3d   : > { %946 = vmatmul.msk.f32.gmra.mxu2 %vm267_vm1, %v941_v27 }
  0x3f   : > { %956 = vmatmul.msk.f32.gmra.mxu3 %vm267_vm1, %v951_v28 }
  0x40   : > { %966 = vmatmul.msk.f32.gmra.mxu0 %vm267_vm1, %v961_v31 }
  0x44   : > { %973 = vmatmul.msk.f32.vlgmr.msra.gmra.mxu1 %vm267_vm1, %v968_v25 }
  0x4c   : > { %974 = vmatmul.msk.f32.gmra.mxu1 %vm267_vm1, %v969_v26 }
  0x54   : > { %975 = vmatmul.msk.f32.gmra.mxu1 %vm267_vm1, %v970_v30 }
  0x5c   : > { %976 = vmatmul.msk.f32.gmra.mxu1 %vm267_vm1, %v971_v32 }
  0x75   : > { %v706_v33 = vpop.permute.xlu2 %705 }
  0x7d   : > { %v710_v34 = vpop.permute.xlu2 %709 }
  0x7e   : > { %v712_v35 = vsel %vm585_vm2, %v706_v33, %v710_v34 }
  0x7f   : > { %1001 = vmatpush.msk.msra.mxu0 %vm280_vm0, %v712_v35 }
  0x80   : > { %1002 = vmatmul.msk.f32.vlgmr.msra.gmra.mxu0 %vm267_vm1, %v997_v36 }
  0x88   : > { %1003 = vmatmul.msk.f32.gmra.mxu0 %vm267_vm1, %v998_v37 }
  0x8c   : > { %v643_v38 = vpop.permute.xlu1 %642  ;;  %v579_v39 = vpop.permute.xlu0 %578 }
  0x90   : > { %1004 = vmatmul.msk.f32.gmra.mxu0 %vm267_vm1, %v999_v42 }
  0x94   : > { %v647_v45 = vpop.permute.xlu1 %646  ;;  %v583_v46 = vpop.permute.xlu0 %582 }
  0x95   : > { %v649_v49 = vsel %vm585_vm2, %v643_v38, %v647_v45  ;;  %v586_v50 = vsel %vm585_vm2, %v579_v39, %v583_v46 }
  0x96   : > { %981 = vmatpush.msk.msra.mxu2 %vm280_vm0, %v586_v50  ;;  %991 = vmatpush.msk.msra.mxu3 %vm280_vm0, %v649_v49 }
  0x97   : > { %982 = vmatmul.msk.f32.vlgmr.msra.gmra.mxu2 %vm267_vm1, %v977_v47  ;;  %992 = vmatmul.msk.f32.vlgmr.msra.gmra.mxu3 %vm267_vm1, %v987_v48 }
  0x98   : > { %1005 = vmatmul.msk.f32.gmra.mxu0 %vm267_vm1, %v1000_v51 }
  0x99   : > { %v304_v59 = vpop.f32.mrf.mxu1 }
  0x9c   : > { %v773_v33 = vpop.permute.xlu0 %772  ;;  %v778_v47 = vpop.permute.xlu1 %777 }
  0x9d   : > { %v301_v60 = vpop.f32.mrf.mxu0 }
  0x9f   : > { %983 = vmatmul.msk.f32.gmra.mxu2 %vm267_vm1, %v978_v53  ;;  %993 = vmatmul.msk.f32.gmra.mxu3 %vm267_vm1, %v988_v54 }
  0xa0   : > { %v307_v62 = vpop.f32.mrf.mxu2 }
  0xa1   : > { %v345_v61 = vpop.f32.mrf.mxu1 }
  0xa2   : > { %v310_v63 = vpop.f32.mrf.mxu3  ;;  %v346_v12 = vadd.f32 %v345_v61, %v301_v60 }
  0xa5   : > { %v506_v0 = vpop.f32.mrf.mxu0 }
  0xa7   : > { %984 = vmatmul.msk.f32.gmra.mxu2 %vm267_vm1, %v979_v55  ;;  %994 = vmatmul.msk.f32.gmra.mxu3 %vm267_vm1, %v989_v56 }
  0xa8   : > { %v396_v2 = vpop.f32.mrf.mxu2 }
  0xa9   : > { %v348_v1 = vpop.f32.mrf.mxu1  ;;  %v408_v13 = vadd.f32 %v396_v2, %v346_v12 }
  0xaa   : > { %v451_v3 = vpop.f32.mrf.mxu3  ;;  %v349_v16 = vadd.f32 %v348_v1, %v304_v59  ;;  %v783_v59 = vpop.permute.xlu2 %782 }
  0xab   : > { %v463_v17 = vadd.f32 %v451_v3, %v408_v13 }
  0xad   : > { %v509_v4 = vpop.f32.mrf.mxu0  ;;  %v518_v20 = vadd.f32 %v506_v0, %v463_v17 }
  0xaf   : > { %985 = vmatmul.msk.f32.gmra.mxu2 %vm267_vm1, %v980_v57  ;;  %995 = vmatmul.msk.f32.gmra.mxu3 %vm267_vm1, %v990_v58 }
  0xb0   : > { %v399_v6 = vpop.f32.mrf.mxu2 }
  0xb1   : > { %v351_v5 = vpop.f32.mrf.mxu1  ;;  %v409_v21 = vadd.f32 %v399_v6, %v349_v16 }
  0xb2   : > { %v454_v7 = vpop.f32.mrf.mxu3  ;;  %v352_v23 = vadd.f32 %v351_v5, %v307_v62  ;;  %v788_v5 = vpop.permute.xlu1 %787 }
  0xb3   : > { %v464_v25 = vadd.f32 %v454_v7, %v409_v21 }
  0xb5   : > { %v512_v8 = vpop.f32.mrf.mxu0  ;;  %v519_v30 = vadd.f32 %v509_v4, %v464_v25 }
  0xb8   : > { %v402_v10 = vpop.f32.mrf.mxu2 }
  0xb9   : > { %v354_v9 = vpop.f32.mrf.mxu1  ;;  %v410_v31 = vadd.f32 %v402_v10, %v352_v23 }
  0xba   : > { %v457_v11 = vpop.f32.mrf.mxu3  ;;  %v355_v36 = vadd.f32 %v354_v9, %v310_v63 }
  0xbb   : > { %v465_v38 = vadd.f32 %v457_v11, %v410_v31 }
  0xbd   : > { %v515_v14 = vpop.f32.mrf.mxu0  ;;  %v520_v44 = vadd.f32 %v512_v8, %v465_v38 }
  0xc0   : > { %v405_v18 = vpop.f32.mrf.mxu2 }
  0xc1   : > { %v561_v15 = vpop.f32.mrf.mxu1  ;;  %v411_v45 = vadd.f32 %v405_v18, %v355_v36 }
  0xc2   : > { %v460_v19 = vpop.f32.mrf.mxu3  ;;  %v573_v24 = vadd.f32 %v561_v15, %v518_v20 }
  0xc3   : > { %v466_v50 = vadd.f32 %v460_v19, %v411_v45 }
  0xc5   : > { %v521_v56 = vadd.f32 %v515_v14, %v466_v50 }
  0xc9   : > { %v564_v26 = vpop.f32.mrf.mxu1 }
  0xca   : > { %v574_v37 = vadd.f32 %v564_v26, %v519_v30 }
  0xd1   : > { %v567_v43 = vpop.f32.mrf.mxu1 }
  0xd2   : > { %v575_v49 = vadd.f32 %v567_v43, %v520_v44 }
  0xd9   : > { %v570_v58 = vpop.f32.mrf.mxu1 }
  0xda   : > { %v576_v61 = vadd.f32 %v570_v58, %v521_v56 }
  0xfd   : > { %v750_v22 = vpop.f32.mrf.mxu0 }
 0x105   : > { %v753_v35 = vpop.f32.mrf.mxu0 }
 0x10d   : > { %v756_v52 = vpop.f32.mrf.mxu0 }
 0x115   : > { %v759_v2 = vpop.f32.mrf.mxu0 }
 0x11a   : > { %v624_v27 = vpop.f32.mrf.mxu2  ;;  %v687_v28 = vpop.f32.mrf.mxu3 }
 0x11b   : > { %v636_v29 = vadd.f32 %v624_v27, %v573_v24 }
 0x11d   : > { %v699_v32 = vadd.f32 %v687_v28, %v636_v29 }
 0x11f   : > { %v762_v34 = vadd.f32 %v750_v22, %v699_v32 }
 0x121   : > { %v790_v39 = vadd.f32 %v773_v33, %v762_v34 }
 0x122   : > { %v627_v40 = vpop.f32.mrf.mxu2  ;;  %v690_v41 = vpop.f32.mrf.mxu3 }
 0x123   : > { %v637_v42 = vadd.f32 %v627_v40, %v574_v37  ;;  %794 = vst [vmem:[%s1430_s10] sm:$0xff] %v790_v39 }
 0x125   : > { %v700_v46 = vadd.f32 %v690_v41, %v637_v42 }
 0x127   : > { %v763_v48 = vadd.f32 %v753_v35, %v700_v46 }
 0x129   : > { %v791_v51 = vadd.f32 %v778_v47, %v763_v48 }
 0x12a   : > { %v630_v53 = vpop.f32.mrf.mxu2  ;;  %v693_v54 = vpop.f32.mrf.mxu3 }
 0x12b   : > { %795 = vst [vmem:[%s1430_s10 + $0x8] sm:$0xff] %v791_v51  ;;  %v638_v55 = vadd.f32 %v630_v53, %v575_v49 }
 0x12d   : > { %v701_v57 = vadd.f32 %v693_v54, %v638_v55 }
 0x12f   : > { %v764_v60 = vadd.f32 %v756_v52, %v701_v57 }
 0x131   : > { %v792_v62 = vadd.f32 %v783_v59, %v764_v60 }
 0x132   : > { %v633_v63 = vpop.f32.mrf.mxu2  ;;  %v696_v0 = vpop.f32.mrf.mxu3 }
 0x133   : > { %796 = vst [vmem:[%s1430_s10 + $0x10] sm:$0xff] %v792_v62  ;;  %v639_v1 = vadd.f32 %v633_v63, %v576_v61 }
 0x135   : > { %v702_v3 = vadd.f32 %v696_v0, %v639_v1 }
 0x137   : > { %v765_v4 = vadd.f32 %v759_v2, %v702_v3 }
 0x139   : > { %v793_v6 = vadd.f32 %v788_v5, %v765_v4 }
 0x13b   : > { %797 = vst [vmem:[%s1430_s10 + $0x18] sm:$0xff] %v793_v6 }
 0x13c   : > { %1105 = shalt.err (!%p1102_p5)
}
 0x13d   : > { %s1160_s13 = smov 128   ;;  %s1161_s14 = smov 8  }
 0x13e   : > { %1016 = dma.vmem_to_hbm [thread:$0]  (%p1227_p4), %s813_s29, 512, %s815_s30, %s799_s18, %s1160_s13, %s1160_s13, %s1161_s14  }
 0x13f PF: > { %p1022_p6 = scmp.ge.s32.totalorder %s1156_s20, 2  ;;  %s829_s10 = sand.u32 1, %s1136_s15  }
 0x140   : > { %s830_s21 = scalar_lea.sflag [#allocation3], %s829_s10 }
 0x141   : > { %p1019_p7 = pnand %p1022_p6, %p1234_p8 }
 0x143   : > { %p1020_p9 = pneg %p1019_p7 }
 0x145   : > { %1131 = dma.done.wait (%p1020_p9), %s830_s21, 512  }
 0x146   : > { %1133 = vsyncadd (%p1020_p9), %s830_s21, 4294966784  ;;  %s17_s20 = sadd.s32 1, %s1156_s20   ;;  %s1482_s15 = smov %s1140_s16 }
 0x147   : > { %p14_p10 = scmp.ge.s32.totalorder %s17_s20, 4   ;;  %s1483_s16 = smov %s1144_s17 }
 0x148   : > { %s1484_s17 = smov %s1240_s28  ;;  %s1485_s18 = smov %s1152_s19 }
 0x149   : > { %s1486_s19 = smov %s1488_s23  ;;  %16 = sbr.rel (!%p14_p10) target bundleno = 4 (0x4), region = 89 }
 0x14e   :  { %836 = vsyncpa [#allocation3], 1 }
 0x14f   :  { %838 = vsyncpa [#allocation3 + $0x1], 1 }

</bundles_post_ra>
